<compile_context>
chip_gen: v6e
topology: v6e:2x2x1
jax: 0.10.0
libtpu: 0.0.40
codegen_flags: <defaults>
</compile_context>

<pallas_src>
import functools

import jax
import jax.numpy as jnp
from jax.experimental import pallas as pl
from jax.experimental.pallas import tpu as pltpu

_LN_EPS = 1e-5  # PyTorch nn.LayerNorm default


def _round_up(x, m):
    return ((x + m - 1) // m) * m


def _round_down(x, m):
    return (x // m) * m


def _addnorm_kernel(x_ref, y_ref, gamma_ref, beta_ref, o_ref, *, chunk):
    """One (tm, hidden) tile: LayerNorm(x + y), processed in `chunk`-row
    sub-chunks so the f32 intermediates stay sub-chunk sized."""
    tile_rows = x_ref.shape[0]
    n_chunks = tile_rows // chunk

    # gamma/beta are (1, hidden) f32 and VMEM-resident across grid steps
    # (constant index_map); no per-step cast.
    g = gamma_ref[...]
    b = beta_ref[...]

    def body(c, carry):
        r0 = pl.multiple_of(c * chunk, chunk)
        s = (x_ref[pl.ds(r0, chunk), :].astype(jnp.float32)
             + y_ref[pl.ds(r0, chunk), :].astype(jnp.float32))
        # Two-pass statistics: numerically robust (matches PyTorch LayerNorm).
        mean = jnp.mean(s, axis=-1, keepdims=True)
        centered = s - mean
        var = jnp.mean(centered * centered, axis=-1, keepdims=True)
        out = centered * jax.lax.rsqrt(var + _LN_EPS) * g + b
        o_ref[pl.ds(r0, chunk), :] = out.astype(o_ref.dtype)
        return carry

    jax.lax.fori_loop(0, n_chunks, body, 0, unroll=True)


def _pick_tile(rows, hidden, itemsize):
    """Choose (row_tile, in-kernel sub-chunk, vmem_limit_bytes) for this chip."""
    try:
        vmem_bytes = int(pltpu.get_tpu_info().vmem_capacity_bytes)
    except Exception:  # conservative fallback = v7x per-core VMEM
        vmem_bytes = 64 << 20

    # ~1/2 of VMEM for the pipelined working set (with the f32 temporaries
    # counted explicitly, 1/3 was over-conservative on 128 MiB parts).
    budget = vmem_bytes // 2

    # Per-row bytes: 3 streams (x, y, out) double-buffered by the pipeline,
    # plus the f32 intermediates (s and the normalized result).  Counting the
    # temporaries at full-tile granularity here is conservative; the kernel
    # only materializes them per <=256-row sub-chunk.
    per_row = 3 * 2 * hidden * itemsize + 2 * hidden * 4
    tm = budget // max(per_row, 1)
    tm = _round_down(min(int(tm), 1024), 8)
    tm = max(tm, 8)

    # Never collapse the grid to a single step: dual-TensorCore chips (v7x)
    # shard the single "parallel" axis across cores, so require >=2 steps
    # (>=4 when rows are large enough not to shrink tiles below ~512).
    rows_cap = _round_up(rows, 8)
    if rows_cap >= 4 * 512:
        max_tm_for_grid = _round_down(rows_cap // 4, 8)
    else:
        max_tm_for_grid = max(8, _round_down(pl.cdiv(rows_cap, 2), 8))
    tm = max(8, min(tm, max_tm_for_grid))

    # In-kernel sub-chunk: bounds the f32 temporaries without shrinking the
    # DMA tile.  chunk always divides tm.
    if tm >= 256:
        tm = _round_down(tm, 256)
        chunk = 256
    else:
        chunk = tm

    # Scoped-VMEM limit: cover the working set with headroom, but never above
    # ~85% of physical VMEM (leave room for Mosaic internal scratch).
    need = (3 * 2 * tm * hidden * itemsize      # double-buffered I/O tiles
            + 2 * chunk * hidden * 4            # f32 s + normalized sub-chunk
            + 2 * hidden * 4)                   # resident gamma/beta (f32)
    vmem_limit = int(min(0.85 * vmem_bytes, max(1.5 * need, 32 << 20)))

    return tm, chunk, vmem_limit


@jax.jit
def addnorm(x, y, gamma, beta):
    """x, y: (batch, seq, hidden); gamma, beta: (hidden,). Inference AddNorm."""
    assert x.shape == y.shape
    batch, seq, hidden = x.shape
    rows = batch * seq
    itemsize = jnp.dtype(x.dtype).itemsize

    x2 = x.reshape(rows, hidden)
    y2 = y.reshape(rows, hidden)
    # Pre-cast once in the wrapper; resident in VMEM across all grid steps.
    g2 = gamma.reshape(1, hidden).astype(jnp.float32)
    b2 = beta.reshape(1, hidden).astype(jnp.float32)

    tm, chunk, vmem_limit = _pick_tile(rows, hidden, itemsize)
    grid = (pl.cdiv(rows, tm),)  # no host padding; tail-tile writes are masked

    kernel = functools.partial(_addnorm_kernel, chunk=chunk)

    out2 = pl.pallas_call(
        kernel,
        out_shape=jax.ShapeDtypeStruct((rows, hidden), x.dtype),
        grid_spec=pltpu.PrefetchScalarGridSpec(
            num_scalar_prefetch=0,
            grid=grid,
            in_specs=[
                pl.BlockSpec((tm, hidden), lambda i: (i, 0)),   # X tile
                pl.BlockSpec((tm, hidden), lambda i: (i, 0)),   # Y tile
                pl.BlockSpec((1, hidden), lambda i: (0, 0)),    # gamma (resident)
                pl.BlockSpec((1, hidden), lambda i: (0, 0)),    # beta  (resident)
            ],
            out_specs=pl.BlockSpec((tm, hidden), lambda i: (i, 0)),
        ),
        compiler_params=pltpu.CompilerParams(
            dimension_semantics=("parallel",),
            vmem_limit_bytes=vmem_limit,
        ),
    )(x2, y2, g2, b2)

    # TODO(synk): training-mode dropout (Bernoulli mask via
    # pltpu.prng_random_bits) is not implemented; semantics match model.eval().
    return out2.reshape(batch, seq, hidden)


def _reference(x, y, gamma, beta):
    s = y.astype(jnp.float32) + x.astype(jnp.float32)
    mean = jnp.mean(s, axis=-1, keepdims=True)
    var = jnp.mean((s - mean) ** 2, axis=-1, keepdims=True)
    return ((s - mean) * jax.lax.rsqrt(var + _LN_EPS)) * gamma + beta


if __name__ == "__main__":
    key = jax.random.PRNGKey(0)

    # Deterministic LayerNorm parameters (PyTorch init: gamma=1, beta=0).
    hidden = 32
    gamma = jnp.ones((hidden,), dtype=jnp.float32)
    beta = jnp.zeros((hidden,), dtype=jnp.float32)

    # Case 1: small BERT-ish toy shape (rows divisible by the row tile).
    batch, seq = 2, 8
    kx, ky, key = jax.random.split(key, 3)
    x = jax.random.normal(kx, (batch, seq, hidden), dtype=jnp.float32)
    y = jax.random.normal(ky, (batch, seq, hidden), dtype=jnp.float32)

    out = jax.block_until_ready(addnorm(x, y, gamma, beta))
    ref = _reference(x, y, gamma, beta)
    assert out.shape == (batch, seq, hidden)
    assert jnp.allclose(out, ref, atol=1e-5, rtol=1e-5)

    # Case 2: rows % row_tile != 0 -> exercises masked tail-tile writeback.
    b2_, s2_ = 3, 5
    kx, ky, key = jax.random.split(key, 3)
    x2 = jax.random.normal(kx, (b2_, s2_, hidden), dtype=jnp.float32)
    y2 = jax.random.normal(ky, (b2_, s2_, hidden), dtype=jnp.float32)
    out2 = jax.block_until_ready(addnorm(x2, y2, gamma, beta))
    ref2 = _reference(x2, y2, gamma, beta)
    assert out2.shape == (b2_, s2_, hidden)
    assert jnp.allclose(out2, ref2, atol=1e-5, rtol=1e-5)

    print("KERNEL_OK")
</pallas_src>

<mosaic_0001>
module attributes {stable_mosaic.version = 11 : i64} {
  func.func @_addnorm_kernel(%arg0: i32, %arg1: memref<8x32xf32, #tpu.memory_space<vmem>>, %arg2: memref<8x32xf32, #tpu.memory_space<vmem>>, %arg3: memref<1x32xf32, #tpu.memory_space<vmem>>, %arg4: memref<1x32xf32, #tpu.memory_space<vmem>>, %arg5: memref<8x32xf32, #tpu.memory_space<vmem>>) attributes {dimension_semantics = [#tpu.dimension_semantics<parallel>], iteration_bounds = array<i64: 2>, scalar_prefetch = 0 : i64, scratch_operands = 0 : i64, tpu.core_type = #tpu.core_type<tc>, window_params = [{transform_indices = @transform_0, window_bounds = array<i64: 8, 32>}, {transform_indices = @transform_1, window_bounds = array<i64: 8, 32>}, {pipeline_mode = #tpu.pipeline_mode<synchronous>, transform_indices = @transform_2, window_bounds = array<i64: 1, 32>}, {pipeline_mode = #tpu.pipeline_mode<synchronous>, transform_indices = @transform_3, window_bounds = array<i64: 1, 32>}, {transform_indices = @transform_4, window_bounds = array<i64: 8, 32>}]} {
    %c0 = arith.constant 0 : index
    %c0_0 = arith.constant 0 : index
    %0 = vector.load %arg3[%c0, %c0_0] : memref<1x32xf32, #tpu.memory_space<vmem>>, vector<1x32xf32>
    %c0_1 = arith.constant 0 : index
    %c0_2 = arith.constant 0 : index
    %1 = vector.load %arg4[%c0_1, %c0_2] : memref<1x32xf32, #tpu.memory_space<vmem>>, vector<1x32xf32>
    %c0_i32 = arith.constant 0 : i32
    %c8_i32 = arith.constant 8 : i32
    %2 = arith.muli %c0_i32, %c8_i32 : i32
    %3 = tpu.assume_multiple %2, 8 : i32
    %4 = arith.index_cast %3 : i32 to index
    %c0_3 = arith.constant 0 : index
    %5 = vector.load %arg1[%4, %c0_3] : memref<8x32xf32, #tpu.memory_space<vmem>>, vector<8x32xf32>
    %6 = arith.index_cast %3 : i32 to index
    %c0_4 = arith.constant 0 : index
    %7 = vector.load %arg2[%6, %c0_4] : memref<8x32xf32, #tpu.memory_space<vmem>>, vector<8x32xf32>
    %8 = arith.addf %5, %7 : vector<8x32xf32>
    %cst = arith.constant dense<0.000000e+00> : vector<8xf32>
    %9 = vector.multi_reduction <add>, %8, %cst [1] : vector<8x32xf32> to vector<8xf32>
    %10 = vector.shape_cast %9 : vector<8xf32> to vector<8x1xf32>
    %cst_5 = arith.constant 3.200000e+01 : f32
    %11 = vector.broadcast %cst_5 : f32 to vector<8x1xf32>
    %12 = arith.divf %10, %11 : vector<8x1xf32>
    %13 = vector.broadcast %12 : vector<8x1xf32> to vector<8x32xf32>
    %14 = arith.subf %8, %13 : vector<8x32xf32>
    %15 = arith.mulf %14, %14 : vector<8x32xf32>
    %cst_6 = arith.constant dense<0.000000e+00> : vector<8xf32>
    %16 = vector.multi_reduction <add>, %15, %cst_6 [1] : vector<8x32xf32> to vector<8xf32>
    %17 = vector.shape_cast %16 : vector<8xf32> to vector<8x1xf32>
    %cst_7 = arith.constant 3.200000e+01 : f32
    %18 = vector.broadcast %cst_7 : f32 to vector<8x1xf32>
    %19 = arith.divf %17, %18 : vector<8x1xf32>
    %cst_8 = arith.constant 9.99999974E-6 : f32
    %20 = vector.broadcast %cst_8 : f32 to vector<8x1xf32>
    %21 = arith.addf %19, %20 : vector<8x1xf32>
    %22 = math.rsqrt %21 : vector<8x1xf32>
    %23 = vector.broadcast %22 : vector<8x1xf32> to vector<8x32xf32>
    %24 = arith.mulf %14, %23 : vector<8x32xf32>
    %25 = vector.broadcast %0 : vector<1x32xf32> to vector<8x32xf32>
    %26 = arith.mulf %24, %25 : vector<8x32xf32>
    %27 = vector.broadcast %1 : vector<1x32xf32> to vector<8x32xf32>
    %28 = arith.addf %26, %27 : vector<8x32xf32>
    %29 = arith.index_cast %3 : i32 to index
    %c0_9 = arith.constant 0 : index
    %30 = vector.load %arg5[%29, %c0_9] : memref<8x32xf32, #tpu.memory_space<vmem>>, vector<8x32xf32>
    tpu.vector_store %arg5[%29, %c0_9], %28 {strides = array<i32>} : memref<8x32xf32, #tpu.memory_space<vmem>>, vector<8x32xf32>,
    %c1_i32 = arith.constant 1 : i32
    return
  }
  func.func @transform_0(%arg0: i32) -> (i32, i32) {
    %c0_i32 = arith.constant 0 : i32
    %c0_i32_0 = arith.constant 0 : i32
    return %arg0, %c0_i32 : i32, i32
  }
  func.func @transform_1(%arg0: i32) -> (i32, i32) {
    %c0_i32 = arith.constant 0 : i32
    %c0_i32_0 = arith.constant 0 : i32
    return %arg0, %c0_i32 : i32, i32
  }
  func.func @transform_2(%arg0: i32) -> (i32, i32) {
    %c0_i32 = arith.constant 0 : i32
    %c0_i32_0 = arith.constant 0 : i32
    %c0_i32_1 = arith.constant 0 : i32
    return %c0_i32, %c0_i32_0 : i32, i32
  }
  func.func @transform_3(%arg0: i32) -> (i32, i32) {
    %c0_i32 = arith.constant 0 : i32
    %c0_i32_0 = arith.constant 0 : i32
    %c0_i32_1 = arith.constant 0 : i32
    return %c0_i32, %c0_i32_0 : i32, i32
  }
  func.func @transform_4(%arg0: i32) -> (i32, i32) {
    %c0_i32 = arith.constant 0 : i32
    %c0_i32_0 = arith.constant 0 : i32
    return %arg0, %c0_i32 : i32, i32
  }
}

</mosaic_0001>

<bundles_post_ra>
// kernel: addnorm.1
= control target key start
LH: loop header
LB: loop body
LE: loop exit
PB: predicated region body
PF: predicated region fallthrough
CT: control target
= control target key end

     0   :  { %9 = vsyncpa [#allocation3], 0  ;;  %s824_s0 = inlined_call_operand.hbm [shape: f32[16,32], index: 0, kind: input, shape index: {}]   ;;  %s825_s1 = inlined_call_operand.hbm [shape: f32[16,32], index: 1, kind: input, shape index: {}]   ;;  %s826_s2 = inlined_call_operand.vmem [shape: f32[1,32], index: 2, kind: input, shape index: {}]   ;;  %s827_s3 = inlined_call_operand.vmem [shape: f32[1,32], index: 3, kind: input, shape index: {}]   ;;  %s828_s4 = inlined_call_operand.hbm [shape: f32[16,32], index: 4, kind: output, shape index: {}]  }
   0x1   :  { %11 = vsyncpa [#allocation3 + $0x1], 0 }
   0x2   :  { %12 = vsyncpa [#allocation6], 0 }
   0x3   :  { %14 = vsyncpa [#allocation6 + $0x1], 0 }
   0x4   :  { %15 = vsyncpa [#allocation4], 0 }
   0x5   :  { %17 = vsyncpa [#allocation4 + $0x1], 0  ;;  %s616_s15 = smov 0   ;;  %s618_s16 = smov 0  }
   0x6   :  { %s620_s17 = smov 0   ;;  %s622_s18 = smov 0  }
   0x7 LB: > { %s637_s19 = sadd.s32 4294967295, %s586_s18   ;;  %s392_s20 = sadd.s32 4294967294, %s586_s18   ;;  %s586_s18 = sphi %s622_s18, %s847_s18   ;;  %s582_s17 = sphi %s620_s17, %s846_s17   ;;  %s578_s16 = sphi %s618_s16, %s845_s16   ;;  %s574_s15 = sphi %s616_s15, %s844_s15  }
   0x8   : > { %s641_s21 = sadd.s32 1, %s586_s18   ;;  %s30_s22 = sadd.s32 1, %s582_s17 }
   0x9   : > { %s27_s23 = ssub.s32 %s586_s18, %s641_s21  ;;  %p37_p0 = scmp.ne.s32.totalorder %s582_s17, %s578_s16 }
   0xa   : > { %p28_p1 = scmp.eq.s32.totalorder %s27_s23, 0  ;;  %p38_p2 = scmp.eq.s32.totalorder %s586_s18, 0 }
   0xb   : > { %p43_p3 = scmp.ne.s32.totalorder %s578_s16, %s574_s15  ;;  %p44_p4 = scmp.eq.s32.totalorder %s637_s19, 0 }
   0xc   : > { %s653_s24 = scalar_select %p28_p1, %s582_s17, %s30_s22  }
   0xd   : > { %p655_p5 = por %p38_p2, %p37_p0  ;;  %p659_p6 = por %p44_p4, %p43_p3 }
   0xe   : > { %p135_p7 = scmp.eq.s32.totalorder %s637_s19, 1  ;;  %p141_p8 = scmp.eq.s32.totalorder %s392_s20, 1 }
   0xf   : > { %s832_s26 = scalar_select %p659_p6, 1, 0 }
  0x10   : > { %p426_p10 = scmp.lt.s32.totalorder %s586_s18, 2  ;;  %p666_p11 = por %p135_p7, %p37_p0 }
  0x11   : > { %p670_p12 = por %p141_p8, %p43_p3  ;;  %s675_s29 = sand.u32 1, %s582_s17  }
  0x12   : > { %s833_s27 = scalar_select %p666_p11, 1, 0 }
  0x13   : > { %s834_s28 = scalar_select %p670_p12, 1, 0 }
  0x14   : > { %s396_s30 = sshll.u32 %s586_s18, 7  ;;  %s395_s5 = sshll.u32 %s675_s29, 3 }
  0x15   : > { %s684_s8 = scalar_lea.hbm %s824_s0, %s396_s30  ;;  %s171_s9 = scalar_lea.vmem [#allocation2], %s395_s5 }
  0x16   : > { %s178_s10 = sshll.u32 %s171_s9, 4  ;;  %p690_p13 = pnand %p426_p10, %p655_p5  ;;  %s694_s10 = int_to_ptr.vmem [resolvable:$true] %s178_s10 }
  0x17   : > { %s168_s12 = scalar_lea.sflag [#allocation3], %s675_s29  ;;  %s462_s13 = scalar_lea.hbm %s684_s8, 128 }
  0x18   : > { %p463_p2 = scmp.ne.s32.totalorder %s684_s8, %s462_s13  ;;  %p464_p3 = pneg %p690_p13 }
  0x19   : > { %s467_s22 = scalar_lea.hbm %s824_s0, 256  ;;  %p468_p5 = scmp.lt.s32.totalorder %s684_s8, %s824_s0 }
  0x1a   : > { %p465_p4 = pnand %p464_p3, %p463_p2  ;;  %p469_p8 = scmp.lt.s32.totalorder %s467_s22, %s462_s13 }
  0x1c   : > { %p466_p7 = pneg %p465_p4  ;;  %p470_p10 = por %p469_p8, %p468_p5 }
  0x1e   : > { %p471_p9 = pnand %p470_p10, %p466_p7 }
  0x20   : > { %474 = shalt.err (!%p471_p9)
}
  0x21   : > { %s475_s6 = scalar_lea.vmem %s694_s10, 128  ;;  %s588_s7 = smov [#allocation2]  }
  0x22   : > { %p476_p0 = scmp.ne.s32.totalorder %s694_s10, %s475_s6  ;;  %s480_s9 = sshll.u32 %s588_s7, 4  ;;  %s481_s9 = int_to_ptr.vmem [resolvable:$false] %s480_s9 }
  0x23   : > { %s482_s14 = scalar_lea.vmem %s481_s9, 256  ;;  %p483_p1 = scmp.lt.s32.totalorder %s694_s10, %s481_s9 }
  0x24   : > { %p478_p2 = pnand %p476_p0, %p464_p3  ;;  %p484_p12 = scmp.lt.s32.totalorder %s482_s14, %s475_s6 }
  0x26   : > { %p479_p4 = pneg %p478_p2  ;;  %p485_p11 = por %p484_p12, %p483_p1 }
  0x28   : > { %p486_p5 = pnand %p485_p11, %p479_p4 }
  0x2a   : > { %489 = shalt.err (!%p486_p5)
}
  0x2b   : > { %418 = dma.hbm_to_vmem [thread:$0]  (!%p690_p13), %s684_s8, 128, %s694_s10, %s168_s12  }
  0x2c   : > { %p836_p9 = scmp.lt.s32.totalorder %s586_s18, 3  ;;  %p837_p0 = scmp.ge.s32.totalorder %s586_s18, 1 }
  0x2d   : > { %s736_s23 = scalar_lea.hbm %s825_s1, %s396_s30  ;;  %s189_s25 = scalar_lea.vmem [#allocation5], %s395_s5 }
  0x2e   : > { %p727_p7 = pnand %p837_p0, %p836_p9  ;;  %s196_s6 = sshll.u32 %s189_s25, 4  ;;  %s197_s6 = int_to_ptr.vmem [resolvable:$true] %s196_s6 }
  0x2f   : > { %s186_s8 = scalar_lea.sflag [#allocation6], %s675_s29  ;;  %s490_s10 = scalar_lea.hbm %s736_s23, 128 }
  0x30   : > { %s838_s13 = scalar_select %p727_p7, 1, 0 }
  0x31   : > { %p491_p11 = scmp.ne.s32.totalorder %s736_s23, %s490_s10  ;;  %s495_s9 = scalar_lea.hbm %s825_s1, 256 }
  0x32   : > { %p496_p8 = scmp.lt.s32.totalorder %s736_s23, %s825_s1  ;;  %p497_p10 = scmp.lt.s32.totalorder %s495_s9, %s490_s10 }
  0x33   : > { %p493_p12 = pnand %p491_p11, %p464_p3 }
  0x34   : > { %p498_p2 = por %p497_p10, %p496_p8 }
  0x35   : > { %p494_p1 = pneg %p493_p12 }
  0x37   : > { %p499_p4 = pnand %p498_p2, %p494_p1 }
  0x39   : > { %502 = shalt.err (!%p499_p4)
}
  0x3a   : > { %s503_s5 = scalar_lea.vmem %s197_s6, 128  ;;  %s589_s29 = smov [#allocation5]  }
  0x3b   : > { %p504_p5 = scmp.ne.s32.totalorder %s197_s6, %s503_s5  ;;  %s508_s20 = sshll.u32 %s589_s29, 4  ;;  %s509_s20 = int_to_ptr.vmem [resolvable:$false] %s508_s20 }
  0x3c   : > { %s510_s22 = scalar_lea.vmem %s509_s20, 256  ;;  %p511_p11 = scmp.lt.s32.totalorder %s197_s6, %s509_s20 }
  0x3d   : > { %p506_p9 = pnand %p504_p5, %p464_p3  ;;  %p512_p12 = scmp.lt.s32.totalorder %s510_s22, %s503_s5 }
  0x3f   : > { %p507_p0 = pneg %p506_p9  ;;  %p513_p6 = por %p512_p12, %p511_p11 }
  0x41   : > { %p514_p7 = pnand %p513_p6, %p507_p0 }
  0x43   : > { %517 = shalt.err (!%p514_p7)
}
  0x44   : > { %421 = dma.hbm_to_vmem [thread:$0]  (!%p690_p13), %s736_s23, 128, %s197_s6, %s186_s8  }
  0x45   : > { %p839_p1 = scmp.ne.s32.totalorder %s838_s13, 0 }
  0x46   : > { %s762_s25 = sand.u32 (!%p839_p1), 1, %s578_s16   ;;  %p840_p6 = scmp.ne.s32.totalorder (!%p839_p1), %s832_s26, 0 }
  0x47   : > { %205 = sbr.rel (%p839_p1) target bundleno = 403 (0x193), region = 36  ;;  %s765_s10 = sshll.u32 (!%p839_p1), %s762_s25, 3 }
  0x48   : > { %s208_s12 = scalar_lea.sflag (!%p839_p1), [#allocation3], %s762_s25  ;;  %s211_s7 = scalar_lea.vmem (!%p839_p1), [#allocation2], %s765_s10 }
  0x4c   : > { %561 = dma.done.wait (%p840_p6), %s208_s12, 128  }
  0x4d   : > { %563 = vsyncadd (%p840_p6), %s208_s12, 4294967168  ;;  %s217_s11 = scalar_lea.sflag [#allocation6], %s762_s25  ;;  %s220_s13 = scalar_lea.vmem [#allocation5], %s765_s10 }
  0x4e   : > { %565 = dma.done.wait (%p840_p6), %s217_s11, 128  }
  0x4f   : > { %567 = vsyncadd (%p840_p6), %s217_s11, 4294967168  ;;  %v252_v0 = vld [vmem:[%s211_s7] sm:$0xff]  ;;  %v253_v1 = vld [vmem:[%s220_s13] sm:$0xff]  ;;  %vm255_vm0 = vcmask 261120   ;;  %s406_s9 = sshll.u32 %s637_s19, 7  ;;  %s249_s30 = scalar_lea.vmem [#allocation7], %s765_s10 }
  0x50   : > { %v254_v2 = vadd.f32 %v253_v1, %v252_v0  ;;  %v403_v13 = vld [vmem:[%s826_s2] ss:$0 sm:$0xff]  ;;  %s299_s14 = sshll.u32 %s249_s30, 4  ;;  %s297_s20 = scalar_lea.hbm %s828_s4, %s406_s9  ;;  %s300_s14 = int_to_ptr.vmem [resolvable:$true] %s299_s14 }
  0x51   : > { %v404_v15 = vld [vmem:[%s827_s3] ss:$0 sm:$0xff]  ;;  %s286_s22 = scalar_lea.sflag [#allocation4], %s762_s25  ;;  %s518_s12 = scalar_lea.vmem %s300_s14, 128 }
  0x52   : > { %v256_v3 = vsel %vm255_vm0, %v254_v2, 0.0  ;;  %p519_p13 = scmp.ne.s32.totalorder %s300_s14, %s518_s12  ;;  %p841_p3 = scmp.ne.s32.totalorder %s833_s27, 0 }
  0x53   : > { %257 = vadd.xlane.f32.xlu0 %v256_v3  ;;  %s590_s7 = smov [#allocation7]  }
  0x54   : > { %p520_p7 = pnand %p519_p13, %p841_p3  ;;  %s522_s11 = sshll.u32 %s590_s7, 4  ;;  %s523_s11 = int_to_ptr.vmem [resolvable:$false] %s522_s11 }
  0x55   : > { %s524_s19 = scalar_lea.vmem %s523_s11, 256  ;;  %p525_p10 = scmp.lt.s32.totalorder %s300_s14, %s523_s11 }
  0x56   : > { %p521_p8 = pneg %p520_p7  ;;  %p526_p2 = scmp.lt.s32.totalorder %s524_s19, %s518_s12 }
  0x58   : > { %p527_p4 = por %p526_p2, %p525_p10 }
  0x5a   : > { %p528_p5 = pnand %p527_p4, %p521_p8 }
  0xdc   : > { %v258_v4 = vpop.xlane.xlu0 %257 }
  0xdd   : > { %v260_v5 = vmul.f32 0.03125, %v258_v4 }
  0xdf   : > { %v261_v6 = vsub.f32 %v254_v2, %v260_v5 }
  0xe1   : > { %v262_v7 = vmul.f32 %v261_v6, %v261_v6 }
  0xe3   : > { %v263_v8 = vsel %vm255_vm0, %v262_v7, 0.0 }
  0xe4   : > { %264 = vadd.xlane.f32.xlu0 %v263_v8 }
 0x16d   : > { %v265_v9 = vpop.xlane.xlu0 %264 }
 0x16e   : > { %v266_v10 = vmul.f32 0.03125, %v265_v9 }
 0x170   : > { %v267_v11 = vadd.f32 1e-05, %v266_v10 }
 0x172   : > { %460 = vrsqrt.f32 %v267_v11 }
 0x17f   : > { %v461_v12 = vpop.eup %460 }
 0x180   : > { %v269_v14 = vmul.f32 %v461_v12, %v261_v6 }
 0x182   : > { %v276_v16 = vmul.f32 %v403_v13, %v269_v14 }
 0x184   : > { %v283_v17 = vadd.f32 %v404_v15, %v276_v16 }
 0x186   : > { %284 = vst.msk [vmem:[%s249_s30] sm:$0xff] %vm255_vm0, %v283_v17 }
 0x187   : > { %531 = shalt.err (!%p528_p5)
}
 0x188   : > { %s532_s10 = scalar_lea.hbm %s297_s20, 128  ;;  %s536_s26 = scalar_lea.hbm %s828_s4, 256 }
 0x189   : > { %p533_p9 = scmp.ne.s32.totalorder %s297_s20, %s532_s10  ;;  %p537_p12 = scmp.lt.s32.totalorder %s297_s20, %s828_s4 }
 0x18a   : > { %p538_p1 = scmp.lt.s32.totalorder %s536_s26, %s532_s10 }
 0x18b   : > { %p534_p0 = pnand %p533_p9, %p841_p3 }
 0x18c   : > { %p539_p6 = por %p538_p1, %p537_p12 }
 0x18d   : > { %p535_p11 = pneg %p534_p0 }
 0x18f   : > { %p540_p13 = pnand %p539_p6, %p535_p11 }
 0x191   : > { %543 = shalt.err (!%p540_p13)
}
 0x192   : > { %413 = dma.vmem_to_hbm [thread:$0]  (%p841_p3), %s300_s14, 128, %s297_s20, %s286_s22  }
 0x193 PF: > { %s311_s8 = sand.u32 1, %s574_s15   ;;  %p842_p7 = scmp.ne.s32.totalorder %s834_s28, 0 }
 0x194   : > { %p843_p8 = scmp.ge.s32.totalorder %s586_s18, 2  ;;  %s312_s9 = scalar_lea.sflag [#allocation4], %s311_s8 }
 0x196   : > { %p423_p10 = pnand %p843_p8, %p842_p7 }
 0x198   : > { %p424_p2 = pneg %p423_p10 }
 0x19a   : > { %569 = dma.done.wait (%p424_p2), %s312_s9, 128  }
 0x19b   : > { %571 = vsyncadd (%p424_p2), %s312_s9, 4294967168  ;;  %p20_p4 = scmp.ge.s32.totalorder %s641_s21, 4   ;;  %s844_s15 = smov %s578_s16 }
 0x19c   : > { %s845_s16 = smov %s582_s17  ;;  %s846_s17 = smov %s653_s24 }
 0x19d   : > { %s847_s18 = smov %s641_s21  ;;  %22 = sbr.rel (!%p20_p4) target bundleno = 7 (0x7), region = 94 }
 0x1a2   :  { %317 = vsyncpa [#allocation3], 1 }
 0x1a3   :  { %319 = vsyncpa [#allocation3 + $0x1], 1 }
 0x1a4   :  { %320 = vsyncpa [#allocation6], 1 }
 0x1a5   :  { %322 = vsyncpa [#allocation6 + $0x1], 1 }
 0x1a6   :  { %323 = vsyncpa [#allocation4], 1 }
 0x1a7   :  { %325 = vsyncpa [#allocation4 + $0x1], 1 }

</bundles_post_ra>
